<compile_context>
chip_gen: v5e
topology: v5e:2x2
jax: 0.10.0
libtpu: 0.0.40
codegen_flags: <defaults>
</compile_context>

<pallas_src>
import jax
import jax.numpy as jnp
from jax.experimental import pallas as pl
from jax.experimental.pallas import tpu as pltpu

_FEATURES = 784
_NEG_CLAMP = -100.0  # PyTorch binary_cross_entropy clamps log terms at -100.


def _cdiv(a, b):
    return -(-a // b)


def _device_is_v7():
    try:
        kind = jax.devices()[0].device_kind.lower()
    except Exception:
        return False
    return "v7" in kind


def _make_kernel(n_rows, tile_rows, steps_per_split, num_splits):
    """Builds the kernel with static shape/masking info closed over."""
    covered_rows = num_splits * steps_per_split * tile_rows
    needs_mask = covered_rows != n_rows

    def kernel(recon_ref, x_ref, mu_ref, logvar_ref, out_ref, acc_ref):
        s = pl.program_id(0)             # per-core partial sum ("parallel")
        i = pl.program_id(1)             # reduction steps ("arbitrary")
        last_i = pl.num_programs(1) - 1

        @pl.when(i == 0)
        def _init():
            acc_ref[...] = jnp.zeros_like(acc_ref)

        r = recon_ref[...].astype(jnp.float32)
        t = x_ref[...].astype(jnp.float32)

        if needs_mask:
            # Mask rows past the logical end of the batch.  With r = 0, t = 0 the
            # contribution is exactly 0 because the clamp runs BEFORE the multiply:
            #   max(log(1-0), -100) + 0 * (max(log(0), -100) - 0) == 0.
            row0 = (s * steps_per_split + i) * tile_rows
            rows = row0 + jax.lax.broadcasted_iota(jnp.int32, r.shape, 0)
            valid = rows < n_rows
            r = jnp.where(valid, r, 0.0)
            t = jnp.where(valid, t, 0.0)

        log_r = jnp.maximum(jnp.log(r), _NEG_CLAMP)
        log_1mr = jnp.maximum(jnp.log(1.0 - r), _NEG_CLAMP)
        # t*log_r + (1-t)*log_1mr == log_1mr + t*(log_r - log_1mr)
        per_elem = log_1mr + t * (log_r - log_1mr)

        # Lane/sublane-preserving partial sums: pure VPU adds into a resident
        # (1, 784) accumulator; no cross-lane reduce or scalar RMW per step.
        acc_ref[...] += jnp.sum(per_elem, axis=0, keepdims=True)

        @pl.when(i == last_i)
        def _finalize():
            bce = -jnp.sum(acc_ref[...])     # single cross-lane reduce per split

            @pl.when(s == 0)
            def _with_kld():                 # KLD folded into split 0 only
                mu = mu_ref[...].astype(jnp.float32)
                lv = logvar_ref[...].astype(jnp.float32)
                kld = -0.5 * jnp.sum(1.0 + lv - mu * mu - jnp.exp(lv))
                out_ref[0, 0] = bce + kld

            @pl.when(s != 0)
            def _without_kld():
                out_ref[0, 0] = bce

    return kernel


def bce_kld_loss(recon_x, x, mu, logvar):
    """recon_x: (N, 784) probabilities in (0,1); x: reshapes to (N, 784); mu/logvar: (B, L)."""
    recon_2d = jnp.reshape(recon_x, (-1, _FEATURES))
    x_2d = jnp.reshape(x, (-1, _FEATURES))            # glue: x.view(-1, 784)
    n_rows = recon_2d.shape[0]

    is_v7 = _device_is_v7()

    # Per-generation tile budget: ~8 MiB/input/buffer on v7x, ~4 MiB on v5e/v6e.
    target_tile_bytes = (8 << 20) if is_v7 else (4 << 20)
    row_bytes = _FEATURES * 4
    max_rows = max(8, ((target_tile_bytes // row_bytes) // 8) * 8)

    if n_rows <= max_rows:
        tile_rows = n_rows            # single block; full-dim block is always legal
    else:
        tile_rows = max_rows          # multiple of 8
    steps_total = _cdiv(n_rows, tile_rows)

    # Split the reduction across TensorCores only where there are two of them
    # (v7x) and only when there is enough work per split.
    req_splits = 2 if is_v7 else 1
    num_splits = req_splits if steps_total >= 2 * req_splits else 1
    steps_per_split = _cdiv(steps_total, num_splits)

    def row_map(s, i):
        blk = s * steps_per_split + i
        # Clamp any fully out-of-range block onto the last real block; the
        # in-kernel row mask zeroes its contribution.
        return (jnp.minimum(blk, steps_total - 1), 0)

    # VMEM footprint: 2 streamed inputs x double buffer, plus small resident refs.
    buffers_bytes = 2 * 2 * tile_rows * row_bytes
    vmem_limit = int(min(max(buffers_bytes + (8 << 20), 32 << 20), 56 << 20))

    kernel = _make_kernel(n_rows, tile_rows, steps_per_split, num_splits)

    partials = pl.pallas_call(
        kernel,
        out_shape=jax.ShapeDtypeStruct((num_splits, 1), jnp.float32),
        grid=(num_splits, steps_per_split),
        in_specs=[
            pl.BlockSpec((tile_rows, _FEATURES), row_map),        # recon_x stream
            pl.BlockSpec((tile_rows, _FEATURES), row_map),        # target stream
            pl.BlockSpec(mu.shape, lambda s, i: (0, 0)),          # mu (resident)
            pl.BlockSpec(logvar.shape, lambda s, i: (0, 0)),      # logvar (resident)
        ],
        out_specs=pl.BlockSpec((1, 1), lambda s, i: (s, 0),
                               memory_space=pltpu.SMEM),
        scratch_shapes=[pltpu.VMEM((1, _FEATURES), jnp.float32)],
        compiler_params=pltpu.CompilerParams(
            dimension_semantics=("parallel", "arbitrary"),
            vmem_limit_bytes=vmem_limit,
        ),
    )(recon_2d, x_2d, mu, logvar)

    return jnp.sum(partials)


def _reference(recon_x, x, mu, logvar):
    x_flat = jnp.reshape(x, (-1, _FEATURES)).astype(jnp.float32)
    r = jnp.reshape(recon_x, (-1, _FEATURES)).astype(jnp.float32)
    log_r = jnp.maximum(jnp.log(r), -100.0)
    log_1mr = jnp.maximum(jnp.log(1.0 - r), -100.0)
    bce = -jnp.sum(x_flat * log_r + (1.0 - x_flat) * log_1mr)
    kld = -0.5 * jnp.sum(1.0 + logvar - mu ** 2 - jnp.exp(logvar))
    return bce + kld


if __name__ == "__main__":
    key = jax.random.PRNGKey(0)
    k1, k2, k3, k4 = jax.random.split(key, 4)

    B, L = 2, 32
    # recon_x must be a probability in (0, 1): sigmoid of a normal draw.
    recon_x = jax.nn.sigmoid(jax.random.normal(k1, (B, 784), dtype=jnp.float32))
    # x is the NCHW image batch; targets in [0, 1].
    x = jax.random.uniform(k2, (B, 1, 28, 28), dtype=jnp.float32)
    mu = jax.random.normal(k3, (B, L), dtype=jnp.float32)
    logvar = jax.random.normal(k4, (B, L), dtype=jnp.float32) * 0.1

    loss_fn = jax.jit(bce_kld_loss)
    loss = jax.block_until_ready(loss_fn(recon_x, x, mu, logvar))
    ref = jax.block_until_ready(_reference(recon_x, x, mu, logvar))
    assert jnp.allclose(loss, ref, rtol=1e-5, atol=1e-3), (loss, ref)

    # Larger ragged batch: exercises multi-step streaming + in-kernel tail masking.
    B2 = 2000
    k5, k6, k7, k8 = jax.random.split(jax.random.PRNGKey(1), 4)
    recon2 = jax.nn.sigmoid(jax.random.normal(k5, (B2, 784), dtype=jnp.float32))
    x2 = jax.random.uniform(k6, (B2, 1, 28, 28), dtype=jnp.float32)
    mu2 = jax.random.normal(k7, (B2, L), dtype=jnp.float32)
    logvar2 = jax.random.normal(k8, (B2, L), dtype=jnp.float32) * 0.1
    loss2 = jax.block_until_ready(loss_fn(recon2, x2, mu2, logvar2))
    ref2 = jax.block_until_ready(_reference(recon2, x2, mu2, logvar2))
    assert jnp.allclose(loss2, ref2, rtol=1e-4, atol=1e-1), (loss2, ref2)

    print("KERNEL_OK")
</pallas_src>

<mosaic_0001>
module attributes {stable_mosaic.version = 11 : i64} {
  func.func @kernel(%arg0: i32, %arg1: i32, %arg2: memref<2x784xf32, #tpu.memory_space<vmem>>, %arg3: memref<2x784xf32, #tpu.memory_space<vmem>>, %arg4: memref<2x32xf32, #tpu.memory_space<vmem>>, %arg5: memref<2x32xf32, #tpu.memory_space<vmem>>, %arg6: memref<1x1xf32, #tpu.memory_space<smem>>, %arg7: memref<1x784xf32, #tpu.memory_space<vmem>>) attributes {dimension_semantics = [#tpu.dimension_semantics<parallel>, #tpu.dimension_semantics<arbitrary>], iteration_bounds = array<i64: 1, 1>, scalar_prefetch = 0 : i64, scratch_operands = 1 : i64, tpu.core_type = #tpu.core_type<tc>, window_params = [{transform_indices = @transform_0, window_bounds = array<i64: 2, 784>}, {transform_indices = @transform_1, window_bounds = array<i64: 2, 784>}, {pipeline_mode = #tpu.pipeline_mode<synchronous>, transform_indices = @transform_2, window_bounds = array<i64: 2, 32>}, {pipeline_mode = #tpu.pipeline_mode<synchronous>, transform_indices = @transform_3, window_bounds = array<i64: 2, 32>}, {transform_indices = @transform_4, window_bounds = array<i64: 1, 1>}]} {
    %c0_i32 = arith.constant 0 : i32
    %0 = arith.cmpi eq, %arg1, %c0_i32 : i32
    %1 = arith.extui %0 : i1 to i32
    %c0_i32_0 = arith.constant 0 : i32
    %2 = arith.cmpi ne, %1, %c0_i32_0 : i32
    scf.if %2 {
      %cst_13 = arith.constant 0.000000e+00 : f32
      %24 = vector.broadcast %cst_13 : f32 to vector<1x784xf32>
      %c0_14 = arith.constant 0 : index
      %c0_15 = arith.constant 0 : index
      %25 = vector.load %arg7[%c0_14, %c0_15] : memref<1x784xf32, #tpu.memory_space<vmem>>, vector<1x784xf32>
      tpu.vector_store %arg7[%c0_14, %c0_15], %24 {strides = array<i32>} : memref<1x784xf32, #tpu.memory_space<vmem>>, vector<1x784xf32>,
    } else {
    }
    %c0 = arith.constant 0 : index
    %c0_1 = arith.constant 0 : index
    %3 = vector.load %arg2[%c0, %c0_1] : memref<2x784xf32, #tpu.memory_space<vmem>>, vector<2x784xf32>
    %c0_2 = arith.constant 0 : index
    %c0_3 = arith.constant 0 : index
    %4 = vector.load %arg3[%c0_2, %c0_3] : memref<2x784xf32, #tpu.memory_space<vmem>>, vector<2x784xf32>
    %5 = math.log %3 : vector<2x784xf32>
    %cst = arith.constant -1.000000e+02 : f32
    %6 = vector.broadcast %cst : f32 to vector<2x784xf32>
    %7 = arith.maximumf %5, %6 : vector<2x784xf32>
    %cst_4 = arith.constant 1.000000e+00 : f32
    %8 = vector.broadcast %cst_4 : f32 to vector<2x784xf32>
    %9 = arith.subf %8, %3 : vector<2x784xf32>
    %10 = math.log %9 : vector<2x784xf32>
    %cst_5 = arith.constant -1.000000e+02 : f32
    %11 = vector.broadcast %cst_5 : f32 to vector<2x784xf32>
    %12 = arith.maximumf %10, %11 : vector<2x784xf32>
    %13 = arith.subf %7, %12 : vector<2x784xf32>
    %14 = arith.mulf %4, %13 : vector<2x784xf32>
    %15 = arith.addf %12, %14 : vector<2x784xf32>
    %c0_6 = arith.constant 0 : index
    %c0_7 = arith.constant 0 : index
    %16 = vector.load %arg7[%c0_6, %c0_7] : memref<1x784xf32, #tpu.memory_space<vmem>>, vector<1x784xf32>
    %cst_8 = arith.constant dense<0.000000e+00> : vector<784xf32>
    %17 = vector.multi_reduction <add>, %15, %cst_8 [0] : vector<2x784xf32> to vector<784xf32>
    %18 = vector.shape_cast %17 : vector<784xf32> to vector<1x784xf32>
    %19 = arith.addf %16, %18 : vector<1x784xf32>
    %c0_9 = arith.constant 0 : index
    %c0_10 = arith.constant 0 : index
    %20 = vector.load %arg7[%c0_9, %c0_10] : memref<1x784xf32, #tpu.memory_space<vmem>>, vector<1x784xf32>
    tpu.vector_store %arg7[%c0_9, %c0_10], %19 {strides = array<i32>} : memref<1x784xf32, #tpu.memory_space<vmem>>, vector<1x784xf32>,
    %c0_i32_11 = arith.constant 0 : i32
    %21 = arith.cmpi eq, %arg1, %c0_i32_11 : i32
    %22 = arith.extui %21 : i1 to i32
    %c0_i32_12 = arith.constant 0 : i32
    %23 = arith.cmpi ne, %22, %c0_i32_12 : i32
    scf.if %23 {
      %c0_13 = arith.constant 0 : index
      %c0_14 = arith.constant 0 : index
      %24 = vector.load %arg7[%c0_13, %c0_14] : memref<1x784xf32, #tpu.memory_space<vmem>>, vector<1x784xf32>
      %25 = vector.shape_cast %24 : vector<1x784xf32> to vector<1x1x784xf32>
      %cst_15 = arith.constant dense<0.000000e+00> : vector<1xf32>
      %26 = vector.multi_reduction <add>, %25, %cst_15 [1, 2] : vector<1x1x784xf32> to vector<1xf32>
      %27 = vector.shape_cast %26 : vector<1xf32> to vector<1x1x1xf32>
      %28 = vector.extract %27[0, 0, 0] : f32 from vector<1x1x1xf32>
      %cst_16 = arith.constant 0.000000e+00 : f32
      %29 = arith.subf %cst_16, %28 : f32
      %c0_i32_17 = arith.constant 0 : i32
      %30 = arith.cmpi eq, %arg0, %c0_i32_17 : i32
      %31 = arith.extui %30 : i1 to i32
      %c0_i32_18 = arith.constant 0 : i32
      %32 = arith.cmpi ne, %31, %c0_i32_18 : i32
      scf.if %32 {
        %c0_21 = arith.constant 0 : index
        %c0_22 = arith.constant 0 : index
        %36 = vector.load %arg4[%c0_21, %c0_22] : memref<2x32xf32, #tpu.memory_space<vmem>>, vector<2x32xf32>
        %c0_23 = arith.constant 0 : index
        %c0_24 = arith.constant 0 : index
        %37 = vector.load %arg5[%c0_23, %c0_24] : memref<2x32xf32, #tpu.memory_space<vmem>>, vector<2x32xf32>
        %cst_25 = arith.constant 1.000000e+00 : f32
        %38 = vector.broadcast %cst_25 : f32 to vector<2x32xf32>
        %39 = arith.addf %38, %37 : vector<2x32xf32>
        %40 = arith.mulf %36, %36 : vector<2x32xf32>
        %41 = arith.subf %39, %40 : vector<2x32xf32>
        %42 = math.exp %37 : vector<2x32xf32>
        %43 = arith.subf %41, %42 : vector<2x32xf32>
        %44 = vector.shape_cast %43 : vector<2x32xf32> to vector<1x2x32xf32>
        %cst_26 = arith.constant dense<0.000000e+00> : vector<1xf32>
        %45 = vector.multi_reduction <add>, %44, %cst_26 [1, 2] : vector<1x2x32xf32> to vector<1xf32>
        %46 = vector.shape_cast %45 : vector<1xf32> to vector<1x1x1xf32>
        %47 = vector.extract %46[0, 0, 0] : f32 from vector<1x1x1xf32>
        %cst_27 = arith.constant -5.000000e-01 : f32
        %48 = arith.mulf %cst_27, %47 : f32
        %49 = arith.addf %29, %48 : f32
        %c0_28 = arith.constant 0 : index
        %c0_29 = arith.constant 0 : index
        %50 = memref.load %arg6[%c0_28, %c0_29] : memref<1x1xf32, #tpu.memory_space<smem>>
        memref.store %49, %arg6[%c0_28, %c0_29] : memref<1x1xf32, #tpu.memory_space<smem>>
      } else {
      }
      %c0_i32_19 = arith.constant 0 : i32
      %33 = arith.cmpi ne, %arg0, %c0_i32_19 : i32
      %34 = arith.extui %33 : i1 to i32
      %c0_i32_20 = arith.constant 0 : i32
      %35 = arith.cmpi ne, %34, %c0_i32_20 : i32
      scf.if %35 {
        %c0_21 = arith.constant 0 : index
        %c0_22 = arith.constant 0 : index
        %36 = memref.load %arg6[%c0_21, %c0_22] : memref<1x1xf32, #tpu.memory_space<smem>>
        memref.store %29, %arg6[%c0_21, %c0_22] : memref<1x1xf32, #tpu.memory_space<smem>>
      } else {
      }
    } else {
    }
    return
  }
  func.func @transform_0(%arg0: i32, %arg1: i32) -> (i32, i32) {
    %c1_i32 = arith.constant 1 : i32
    %0 = arith.muli %arg0, %c1_i32 : i32
    %1 = arith.addi %0, %arg1 : i32
    %c0_i32 = arith.constant 0 : i32
    %2 = arith.minsi %1, %c0_i32 : i32
    %c0_i32_0 = arith.constant 0 : i32
    %c0_i32_1 = arith.constant 0 : i32
    return %2, %c0_i32_0 : i32, i32
  }
  func.func @transform_1(%arg0: i32, %arg1: i32) -> (i32, i32) {
    %c1_i32 = arith.constant 1 : i32
    %0 = arith.muli %arg0, %c1_i32 : i32
    %1 = arith.addi %0, %arg1 : i32
    %c0_i32 = arith.constant 0 : i32
    %2 = arith.minsi %1, %c0_i32 : i32
    %c0_i32_0 = arith.constant 0 : i32
    %c0_i32_1 = arith.constant 0 : i32
    return %2, %c0_i32_0 : i32, i32
  }
  func.func @transform_2(%arg0: i32, %arg1: i32) -> (i32, i32) {
    %c0_i32 = arith.constant 0 : i32
    %c0_i32_0 = arith.constant 0 : i32
    %c0_i32_1 = arith.constant 0 : i32
    return %c0_i32, %c0_i32_0 : i32, i32
  }
  func.func @transform_3(%arg0: i32, %arg1: i32) -> (i32, i32) {
    %c0_i32 = arith.constant 0 : i32
    %c0_i32_0 = arith.constant 0 : i32
    %c0_i32_1 = arith.constant 0 : i32
    return %c0_i32, %c0_i32_0 : i32, i32
  }
  func.func @transform_4(%arg0: i32, %arg1: i32) -> (i32, i32) {
    %c0_i32 = arith.constant 0 : i32
    %c0_i32_0 = arith.constant 0 : i32
    return %arg0, %c0_i32 : i32, i32
  }
}

</mosaic_0001>

<bundles_post_ra>
// kernel: bce_kld_loss.1
= control target key start
LH: loop header
LB: loop body
LE: loop exit
PB: predicated region body
PF: predicated region fallthrough
CT: control target
= control target key end

     0   :  { %v82_v0 = vlaneseq  ;;  %s417_s0 = inlined_call_operand.vmem [shape: f32[2,784], index: 0, kind: input, shape index: {}]   ;;  %s418_s1 = inlined_call_operand.vmem [shape: f32[2,784], index: 1, kind: input, shape index: {}]   ;;  %s419_s2 = inlined_call_operand.vmem [shape: f32[2,32], index: 2, kind: input, shape index: {}]   ;;  %s420_s3 = inlined_call_operand.vmem [shape: f32[2,32], index: 3, kind: input, shape index: {}]   ;;  %s421_s4 = inlined_call_operand.hbm [shape: f32[1,1], index: 4, kind: output, shape index: {}]  }
   0x1   :  { %v87_v1 = vld [vmem:[%s417_s0] sm:$0xff]  ;;  %v88_v2 = vld [vmem:[%s417_s0 + $0x8] sm:$0x3f] }
   0x2   :  { %322 = vlog2.f32 %v87_v1  ;;  %v97_v3 = vsub.f32 1.0, %v87_v1  ;;  %v98_v4 = vsub.f32 1.0, %v88_v2  ;;  %vm379_vm0 = vcmp.lt.s32.totalorder %v82_v0, 784 }
   0x3   :  { %324 = vlog2.f32 %v88_v2 }
   0x4   :  { %9 = vsyncpa [#allocation4], 0  ;;  %v346_v6 = vmov 0.0   ;;  %326 = vlog2.f32 %v97_v3  ;;  %v89_v18 = vld [vmem:[%s418_s1] sm:$0xff]  ;;  %v90_v20 = vld [vmem:[%s418_s1 + $0x8] sm:$0x3f] }
   0x5   :  { %86 = vst.msk [vmem:[#allocation2] sm:$0x7f] %vm379_vm0, %v346_v6  ;;  %328 = vlog2.f32 %v98_v4  ;;  %vm131_vm1 = vcmask 1041408   ;;  %vm174_vm2 = vcmask 123904   ;;  %vm195_vm3 = vcmask 1040384   ;;  %s294_s26 = sshll.u32 %s421_s4, 4  ;;  %s295_s26 = int_to_ptr.hbm [resolvable:$true] %s294_s26 }
   0x6   :  { %vm197_vm4 = vcmask 1042434   ;;  %vm200_vm5 = vcmask 1044484   ;;  %vm202_vm6 = vcmask 1045508   ;;  %vm204_vm7 = vcmask 1043456   ;;  %s347_s5 = smov [#allocation3]  }
   0x7   :  { %vm243_vm8 = vcmask 122880   ;;  %vm268_vm9 = vcmask 254976  }
   0x8   :  { %v323_v7 = vpop.eup %322 }
   0x9   :  { %v325_v8 = vpop.eup %324  ;;  %v92_v9 = vmul.f32 0.6931472, %v323_v7 }
   0xa   :  { %v327_v10 = vpop.eup %326  ;;  %v94_v11 = vmul.f32 0.6931472, %v325_v8 }
   0xb   :  { %v329_v12 = vpop.eup %328  ;;  %v95_v13 = vmax.f32 %v92_v9, -100.0  ;;  %v100_v14 = vmul.f32 0.6931472, %v327_v10 }
   0xc   :  { %v96_v15 = vmax.f32 %v94_v11, -100.0  ;;  %v102_v16 = vmul.f32 0.6931472, %v329_v12 }
   0xd   :  { %v103_v17 = vmax.f32 %v100_v14, -100.0 }
   0xe   :  { %v104_v19 = vmax.f32 %v102_v16, -100.0 }
   0xf   :  { %v105_v21 = vsub.f32 %v95_v13, %v103_v17 }
  0x10   :  { %v106_v22 = vsub.f32 %v96_v15, %v104_v19 }
  0x11   :  { %v107_v23 = vmul.f32 %v105_v21, %v89_v18 }
  0x12   :  { %v108_v24 = vmul.f32 %v106_v22, %v90_v20 }
  0x13   :  { %v109_v25 = vadd.f32 %v107_v23, %v103_v17 }
  0x14   :  { %v110_v26 = vadd.f32 %v108_v24, %v104_v19 }
  0x15   :  { %114 = vst [vmem:[#allocation1] ss:$4 sm:$0xff] %v109_v25 }
  0x16   :  { %116 = vst [vmem:[#allocation1 + $0x20] ss:$4 sm:$0xff] %v110_v26 }
  0x1c   :  { %v117_v27 = vld.sshfl [vmem:[#allocation1] sm:$0xff pattern:$0x73625140]  ;;  %v118_v28 = vld.sshfl [vmem:[#allocation1 + $0x8] sm:$0xff pattern:$0x73625140] }
  0x1d   :  { %v119_v29 = vld.sshfl [vmem:[#allocation1 + $0x10] sm:$0xff pattern:$0x73625140]  ;;  %v120_v30 = vld.sshfl [vmem:[#allocation1 + $0x18] sm:$0xff pattern:$0x73625140] }
  0x1e   :  { %v121_v31 = vld.sshfl [vmem:[#allocation1 + $0x20] sm:$0xff pattern:$0x73625140]  ;;  %v122_v32 = vld.sshfl [vmem:[#allocation1 + $0x28] sm:$0xff pattern:$0x73625140] }
  0x1f   :  { %v123_v33 = vld.sshfl [vmem:[#allocation1 + $0x30] sm:$0xff pattern:$0x73625140]  ;;  %v132_v34 = vsel %vm131_vm1, %v117_v27, 0.0  ;;  %v139_v35 = vsel %vm131_vm1, %v118_v28, 0.0  ;;  %v146_v36 = vsel %vm131_vm1, %v119_v29, 0.0 }
  0x20   :  { %v133_v37 = vrot.slane %v132_v34, 4  ;;  %v140_v38 = vrot.slane %v139_v35, 4  ;;  %v147_v39 = vrot.slane %v146_v36, 4  ;;  %v153_v40 = vsel %vm131_vm1, %v120_v30, 0.0  ;;  %v111_v29 = vld [vmem:[#allocation2] sm:$0x7f] }
  0x21   :  { %v154_v41 = vrot.slane %v153_v40, 4  ;;  %v160_v42 = vsel %vm131_vm1, %v121_v31, 0.0  ;;  %v167_v43 = vsel %vm131_vm1, %v122_v32, 0.0  ;;  %v175_v44 = vsel %vm174_vm2, %v123_v33, 0.0 }
  0x22   :  { %v134_v45 = vadd.f32 %v133_v37, %v132_v34  ;;  %v141_v46 = vadd.f32 %v140_v38, %v139_v35  ;;  %v148_v47 = vadd.f32 %v147_v39, %v146_v36  ;;  %v161_v48 = vrot.slane %v160_v42, 4  ;;  %v261_v39 = vld [vmem:[%s420_s3] sm:$0x3] }
  0x23   :  { %v155_v49 = vadd.f32 %v154_v41, %v153_v40  ;;  %v168_v50 = vrot.slane %v167_v43, 4  ;;  %v176_v51 = vrot.slane %v175_v44, 4 }
  0x24   :  { %v135_v52 = vrot.slane %v134_v45, 2  ;;  %v142_v53 = vrot.slane %v141_v46, 2  ;;  %v149_v54 = vrot.slane %v148_v47, 2  ;;  %v162_v55 = vadd.f32 %v161_v48, %v160_v42  ;;  %v260_v48 = vld [vmem:[%s419_s2] sm:$0x3] }
  0x25   :  { %v156_v56 = vrot.slane %v155_v49, 2  ;;  %v169_v57 = vadd.f32 %v168_v50, %v167_v43  ;;  %v177_v58 = vadd.f32 %v176_v51, %v175_v44 }
  0x26   :  { %v136_v59 = vadd.f32 %v135_v52, %v134_v45  ;;  %v143_v60 = vadd.f32 %v142_v53, %v141_v46  ;;  %v150_v61 = vadd.f32 %v149_v54, %v148_v47  ;;  %v163_v62 = vrot.slane %v162_v55, 2 }
  0x27   :  { %v157_v63 = vadd.f32 %v156_v56, %v155_v49  ;;  %v170_v0 = vrot.slane %v169_v57, 2  ;;  %v178_v1 = vrot.slane %v177_v58, 2  ;;  %v265_v45 = vmul.f32 1.442695, %v261_v39 }
  0x28   :  { %v137_v2 = vrot.slane %v136_v59, 1  ;;  %v144_v3 = vrot.slane %v143_v60, 1  ;;  %v151_v4 = vrot.slane %v150_v61, 1  ;;  %v164_v6 = vadd.f32 %v163_v62, %v162_v55 }
  0x29   :  { %v158_v7 = vrot.slane %v157_v63, 1  ;;  %v171_v8 = vadd.f32 %v170_v0, %v169_v57  ;;  %v179_v9 = vadd.f32 %v178_v1, %v177_v58  ;;  %330 = vpow2.f32 %v265_v45 }
  0x2a   :  { %v138_v10 = vadd.f32 %v137_v2, %v136_v59  ;;  %v145_v11 = vadd.f32 %v144_v3, %v143_v60  ;;  %v152_v12 = vadd.f32 %v151_v4, %v150_v61  ;;  %v165_v13 = vrot.slane %v164_v6, 1 }
  0x2b   :  { %v159_v14 = vadd.f32 %v158_v7, %v157_v63  ;;  %v172_v15 = vrot.slane %v171_v8, 1  ;;  %v180_v16 = vrot.slane %v179_v9, 1  ;;  %v262_v53 = vadd.f32 1.0, %v261_v39 }
  0x2c   :  { %v166_v17 = vadd.f32 %v165_v13, %v164_v6  ;;  %v189_v18 = vrot.slane %v145_v11, 7  ;;  %v190_v19 = vrot.slane %v152_v12, 6  ;;  %v263_v54 = vmul.f32 %v260_v48, %v260_v48 }
  0x2d   :  { %v173_v20 = vadd.f32 %v172_v15, %v171_v8  ;;  %v181_v21 = vadd.f32 %v180_v16, %v179_v9  ;;  %v191_v22 = vrot.slane %v159_v14, 5 }
  0x2e   :  { %v192_v23 = vrot.slane %v166_v17, 4  ;;  %v196_v24 = vsel %vm195_vm3, %v138_v10, %v189_v18  ;;  %v264_v58 = vsub.f32 %v262_v53, %v263_v54 }
  0x2f   :  { %v193_v25 = vrot.slane %v173_v20, 3  ;;  %v194_v26 = vrot.slane %v181_v21, 2  ;;  %v198_v27 = vsel %vm197_vm4, %v190_v19, %v191_v22  ;;  %v331_v59 = vpop.eup %330 }
  0x30   :  { %v199_v28 = vsel %vm131_vm1, %v196_v24, %v198_v27  ;;  %v267_v61 = vsub.f32 %v264_v58, %v331_v59 }
  0x31   :  { %v201_v30 = vsel %vm200_vm5, %v192_v23, %v193_v25 }
  0x32   :  { %v203_v31 = vsel %vm202_vm6, %v201_v30, %v194_v26  ;;  %v269_v62 = vsel %vm268_vm9, %v267_v61, 0.0 }
  0x33   :  { %v205_v32 = vsel %vm204_vm7, %v199_v28, %v203_v31 }
  0x34   :  { %v207_v33 = vadd.f32 %v205_v32, %v111_v29 }
  0x36   :  { %212 = vst.msk [vmem:[#allocation2] sm:$0x7f] %vm379_vm0, %v207_v33 }
  0x3d   :  { %v216_v34 = vld [vmem:[#allocation2] sm:$0x7f] }
  0x3e   :  { %v218_v35 = vperm.slane %v216_v34, 0  ;;  %v219_v36 = vperm.slane %v216_v34, 1  ;;  %v220_v37 = vperm.slane %v216_v34, 2  ;;  %v221_v38 = vperm.slane %v216_v34, 3 }
  0x3f   :  { %v222_v40 = vperm.slane %v216_v34, 4  ;;  %v223_v5 = vperm.slane %v216_v34, 5  ;;  %v224_v49 = vperm.slane %v216_v34, 6 }
  0x40   :  { %v232_v41 = vsel %vm195_vm3, %v218_v35, 0.0  ;;  %v233_v42 = vsel %vm195_vm3, %v219_v36, 0.0  ;;  %v235_v43 = vsel %vm195_vm3, %v220_v37, 0.0  ;;  %v237_v46 = vsel %vm195_vm3, %v221_v38, 0.0 }
  0x41   :  { %v234_v44 = vadd.f32 %v233_v42, %v232_v41  ;;  %v239_v50 = vsel %vm195_vm3, %v222_v40, 0.0  ;;  %v241_v52 = vsel %vm195_vm3, %v223_v5, 0.0  ;;  %v244_v56 = vsel %vm243_vm8, %v224_v49, 0.0 }
  0x43   :  { %v236_v47 = vadd.f32 %v235_v43, %v234_v44 }
  0x45   :  { %v238_v51 = vadd.f32 %v237_v46, %v236_v47 }
  0x47   :  { %v240_v55 = vadd.f32 %v239_v50, %v238_v51 }
  0x49   :  { %v242_v57 = vadd.f32 %v241_v52, %v240_v55 }
  0x4b   :  { %v245_v60 = vadd.f32 %v244_v56, %v242_v57 }
  0x4d   :  { %246 = vadd.xlane.f32.xlu0 %v245_v60 }
  0x55   :  { %270 = vadd.xlane.f32.xlu0 %v269_v62 }
  0xc0   :  { %v247_v63 = vpop.xlane.xlu0 %246 }
  0xc1   :  { %v248_v0 = vrot.slane %v247_v63, 4 }
  0xc3   :  { %v249_v1 = vadd.f32 %v248_v0, %v247_v63 }
  0xc5   :  { %v250_v2 = vrot.slane %v249_v1, 2 }
  0xc7   :  { %v251_v3 = vadd.f32 %v250_v2, %v249_v1 }
  0xc8   :  { %v271_v4 = vpop.xlane.xlu0 %270 }
  0xc9   :  { %v272_v6 = vrot.slane %v271_v4, 4  ;;  %v252_v7 = vrot.slane %v251_v3, 1 }
  0xcb   :  { %v273_v8 = vadd.f32 %v272_v6, %v271_v4  ;;  %v253_v9 = vadd.f32 %v252_v7, %v251_v3 }
  0xcd   :  { %v274_v10 = vrot.slane %v273_v8, 2  ;;  %316 = vpush %v253_v9 }
  0xcf   :  { %v275_v11 = vadd.f32 %v274_v10, %v273_v8 }
  0xd1   :  { %v276_v12 = vrot.slane %v275_v11, 1 }
  0xd3   :  { %v277_v13 = vadd.f32 %v276_v12, %v275_v11 }
  0xd5   :  { %318 = vpush %v277_v13 }
  0xfe   :  { %s317_s2 = spop %316 }
  0xff   :  { %s255_s28 = ssub.f32 0.0, %s317_s2 }
 0x106   :  { %s319_s27 = spop %318 }
 0x107   :  { %s279_s29 = smul.f32 -0.5, %s319_s27 }
 0x109   :  { %s280_s30 = sadd.f32 %s279_s29, %s255_s28 }
 0x10b   :  { %282 = sst [smem:[#allocation3]] %s280_s30 }
 0x10c   :  { %297 = dma.smem_to_hbm %s347_s5, 16, %s295_s26, [#allocation4]  }
 0x10d   :  { %344 = dma.done.wait [#allocation4], 16  }
 0x10e   :  { %345 = vsyncadd [#allocation4], 4294967280 }
 0x10f   :  { %302 = sfence }
 0x110   :  { %303 = vsyncpa [#allocation4], 1 }

</bundles_post_ra>
